<compile_context>
chip_gen: v7x
topology: tpu7x:2x2x1
jax: 0.10.0
libtpu: 0.0.40
codegen_flags: <defaults>
</compile_context>

<pallas_src>
import functools
import math

import jax
import jax.numpy as jnp
from jax.experimental import pallas as pl
from jax.experimental.pallas import tpu as pltpu


# Resident-VMEM target for the pipelined blocks (2x in + 2x out + f32 temps).
# Conservative enough for v7x (64 MiB physical / 32 MiB scoped default) while
# still giving 256+ row tiles at d_model=4096 f32.
_VMEM_PIPELINE_BUDGET = 24 * 1024 * 1024
# Explicit scoped-VMEM limit: above the v5e 16 MiB / v6e-v7x 32 MiB defaults,
# below every generation's physical VMEM.
_VMEM_LIMIT_BYTES = 48 * 1024 * 1024
_MAX_TILE_ROWS = 1024


def _rmsnorm_kernel(x_ref, w_ref, o_ref, *, eps: float):
    # x_ref: (TILE_ROWS, D), w_ref: (1, D), o_ref: (TILE_ROWS, D)
    x = x_ref[...].astype(jnp.float32)
    w = w_ref[...].astype(jnp.float32)                    # broadcasts over rows
    mean_sq = jnp.mean(x * x, axis=-1, keepdims=True)     # (TILE_ROWS, 1)
    inv = jax.lax.rsqrt(mean_sq + eps)                    # EUP, hides under DMA
    o_ref[...] = (x * inv * w).astype(o_ref.dtype)


def _sublane_multiple(dtype) -> int:
    """Row granularity so sub-32-bit dtypes fill packed sublanes."""
    itemsize = jnp.dtype(dtype).itemsize
    return 8 * max(1, 4 // itemsize)     # 8 for f32, 16 for bf16, 32 for i8/fp8


def _pick_tile_rows(rows: int, d_model: int, dtype) -> int:
    sub = _sublane_multiple(dtype)
    itemsize = jnp.dtype(dtype).itemsize
    # Per-row resident bytes: double-buffered input + output blocks in the
    # native dtype, plus ~2 f32-block-sized temporaries for the upcast math.
    per_row = d_model * (4 * itemsize + 2 * 4)
    t = _VMEM_PIPELINE_BUDGET // max(per_row, 1)
    t = max(sub, (t // sub) * sub)
    t = min(t, _MAX_TILE_ROWS)
    # Never make the block larger than the (sublane-rounded) data.
    rows_rounded = ((rows + sub - 1) // sub) * sub
    return int(min(t, max(rows_rounded, sub)))


def rmsnorm(x: jax.Array, weight: jax.Array, eps: float = 1e-5,
            tile_rows: int | None = None) -> jax.Array:
    """RMSNorm over the last axis of x, matching the PyTorch module."""
    orig_shape = x.shape
    d_model = orig_shape[-1]
    rows = math.prod(orig_shape[:-1]) if len(orig_shape) > 1 else 1

    x2d = x.reshape(rows, d_model)
    w2d = weight.reshape(1, d_model)

    if tile_rows is None:
        tile_rows = _pick_tile_rows(rows, d_model, x.dtype)

    grid = (pl.cdiv(rows, tile_rows),)   # ragged last block handled by Pallas

    out = pl.pallas_call(
        functools.partial(_rmsnorm_kernel, eps=eps),
        out_shape=jax.ShapeDtypeStruct((rows, d_model), x.dtype),
        grid_spec=pltpu.PrefetchScalarGridSpec(
            num_scalar_prefetch=0,
            grid=grid,
            in_specs=[
                pl.BlockSpec((tile_rows, d_model), lambda i: (i, 0)),
                # Constant index_map -> weight stays resident, no re-DMA.
                pl.BlockSpec((1, d_model), lambda i: (0, 0)),
            ],
            out_specs=pl.BlockSpec((tile_rows, d_model), lambda i: (i, 0)),
        ),
        compiler_params=pltpu.CompilerParams(
            dimension_semantics=("parallel",),
            vmem_limit_bytes=_VMEM_LIMIT_BYTES,
        ),
    )(x2d, w2d)

    return out.reshape(orig_shape)


def _rmsnorm_ref(x, weight, eps):
    xf = x.astype(jnp.float32)
    wf = weight.astype(jnp.float32)
    y = xf * jax.lax.rsqrt(jnp.mean(xf * xf, axis=-1, keepdims=True) + eps) * wf
    return y.astype(x.dtype)


if __name__ == "__main__":
    key = jax.random.PRNGKey(0)
    k1, k2, k3 = jax.random.split(key, 3)
    eps = 1e-5

    # --- Test 1: small f32 case matching the module's default init. ---------
    batch, seq, d_model = 2, 8, 32
    x = jax.random.normal(k1, (batch, seq, d_model), dtype=jnp.float32)
    weight = jnp.ones((d_model,), dtype=jnp.float32)   # nn.Parameter(torch.ones)

    y = rmsnorm(x, weight, eps=eps)
    jax.block_until_ready(y)
    ref = _rmsnorm_ref(x, weight, eps)
    assert y.shape == x.shape and y.dtype == x.dtype
    assert jnp.allclose(y, ref, atol=1e-5, rtol=1e-5)

    # --- Test 2: bf16, non-trivial weight, ragged row count (exercises the
    #             cdiv grid + masked final block and the 16-row sublane rule).
    b2, s2, d2 = 3, 50, 256
    x2 = jax.random.normal(k2, (b2, s2, d2), dtype=jnp.bfloat16)
    w2 = (1.0 + 0.1 * jax.random.normal(k3, (d2,), dtype=jnp.float32)
          ).astype(jnp.bfloat16)

    y2 = rmsnorm(x2, w2, eps=eps)
    jax.block_until_ready(y2)
    ref2 = _rmsnorm_ref(x2, w2, eps)
    assert y2.shape == x2.shape and y2.dtype == x2.dtype
    assert jnp.allclose(y2.astype(jnp.float32), ref2.astype(jnp.float32),
                        atol=2e-2, rtol=2e-2)

    # NOTE: for real deployments keep d_model a multiple of 128 so output
    # stores are lane-dense (the demo's d_model=32 is intentionally tiny).
    print("KERNEL_OK")
</pallas_src>

<mosaic_0001>
module attributes {stable_mosaic.version = 11 : i64} {
  func.func @_rmsnorm_kernel(%arg0: i32, %arg1: memref<16x32xf32, #tpu.memory_space<vmem>>, %arg2: memref<1x32xf32, #tpu.memory_space<vmem>>, %arg3: memref<16x32xf32, #tpu.memory_space<vmem>>) attributes {dimension_semantics = [#tpu.dimension_semantics<parallel>], iteration_bounds = array<i64: 1>, scalar_prefetch = 0 : i64, scratch_operands = 0 : i64, tpu.core_type = #tpu.core_type<tc>, window_params = [{transform_indices = @transform_0, window_bounds = array<i64: 16, 32>}, {pipeline_mode = #tpu.pipeline_mode<synchronous>, transform_indices = @transform_1, window_bounds = array<i64: 1, 32>}, {transform_indices = @transform_2, window_bounds = array<i64: 16, 32>}]} {
    %c0 = arith.constant 0 : index
    %c0_0 = arith.constant 0 : index
    %0 = vector.load %arg1[%c0, %c0_0] : memref<16x32xf32, #tpu.memory_space<vmem>>, vector<16x32xf32>
    %c0_1 = arith.constant 0 : index
    %c0_2 = arith.constant 0 : index
    %1 = vector.load %arg2[%c0_1, %c0_2] : memref<1x32xf32, #tpu.memory_space<vmem>>, vector<1x32xf32>
    %2 = arith.mulf %0, %0 : vector<16x32xf32>
    %cst = arith.constant dense<0.000000e+00> : vector<16xf32>
    %3 = vector.multi_reduction <add>, %2, %cst [1] : vector<16x32xf32> to vector<16xf32>
    %4 = vector.shape_cast %3 : vector<16xf32> to vector<16x1xf32>
    %cst_3 = arith.constant 3.200000e+01 : f32
    %5 = vector.broadcast %cst_3 : f32 to vector<16x1xf32>
    %6 = arith.divf %4, %5 : vector<16x1xf32>
    %cst_4 = arith.constant 9.99999974E-6 : f32
    %7 = vector.broadcast %cst_4 : f32 to vector<16x1xf32>
    %8 = arith.addf %6, %7 : vector<16x1xf32>
    %9 = math.rsqrt %8 : vector<16x1xf32>
    %10 = vector.broadcast %9 : vector<16x1xf32> to vector<16x32xf32>
    %11 = arith.mulf %0, %10 : vector<16x32xf32>
    %12 = vector.broadcast %1 : vector<1x32xf32> to vector<16x32xf32>
    %13 = arith.mulf %11, %12 : vector<16x32xf32>
    %c0_5 = arith.constant 0 : index
    %c0_6 = arith.constant 0 : index
    %14 = vector.load %arg3[%c0_5, %c0_6] : memref<16x32xf32, #tpu.memory_space<vmem>>, vector<16x32xf32>
    tpu.vector_store %arg3[%c0_5, %c0_6], %13 {strides = array<i32>} : memref<16x32xf32, #tpu.memory_space<vmem>>, vector<16x32xf32>,
    return
  }
  func.func @transform_0(%arg0: i32) -> (i32, i32) {
    %c0_i32 = arith.constant 0 : i32
    %c0_i32_0 = arith.constant 0 : i32
    return %arg0, %c0_i32 : i32, i32
  }
  func.func @transform_1(%arg0: i32) -> (i32, i32) {
    %c0_i32 = arith.constant 0 : i32
    %c0_i32_0 = arith.constant 0 : i32
    %c0_i32_1 = arith.constant 0 : i32
    return %c0_i32, %c0_i32_0 : i32, i32
  }
  func.func @transform_2(%arg0: i32) -> (i32, i32) {
    %c0_i32 = arith.constant 0 : i32
    %c0_i32_0 = arith.constant 0 : i32
    return %arg0, %c0_i32 : i32, i32
  }
}

</mosaic_0001>

<bundles_post_ra>
// kernel: tpu_custom_call.1
= control target key start
LH: loop header
LB: loop body
LE: loop exit
PB: predicated region body
PF: predicated region fallthrough
CT: control target
= control target key end

     0   :  { %7 = vsyncpa [#allocation3], 0  ;;  %s187_s0 = inlined_call_operand.hbm [shape: f32[16,32], index: 0, kind: input, shape index: {}]   ;;  %s188_s1 = inlined_call_operand.vmem [shape: f32[1,32], index: 1, kind: input, shape index: {}]   ;;  %s189_s2 = inlined_call_operand.hbm [shape: f32[16,32], index: 2, kind: output, shape index: {}]  }
   0x1   :  { %8 = vsyncpa [#allocation4], 0  ;;  %s131_s9 = smov [#allocation2]   ;;  %s83_s13 = scalar_lea.hbm %s187_s0, 256 }
   0x2   :  { %s14_s10 = sshll.u32 %s131_s9, 4  ;;  %p84_p0 = scmp.ne.s32.totalorder %s187_s0, %s83_s13  ;;  %s15_s10 = int_to_ptr.vmem [resolvable:$true] %s14_s10 }
   0x3   :  { %p87_p1 = scmp.lt.u32.totalorder %s83_s13, %s187_s0 }
   0x5   :  { %p89_p2 = pnand %p87_p1, %p84_p0 }
   0x7   :  { %92 = shalt.err (!%p89_p2)
}
   0x8   :  { %s93_s18 = scalar_lea.vmem %s15_s10, 256  ;;  %p98_p4 = scmp.lt.s32.totalorder %s15_s10, %s15_s10 }
   0x9   :  { %p94_p3 = scmp.ne.s32.totalorder %s15_s10, %s93_s18  ;;  %p99_p5 = scmp.lt.s32.totalorder %s93_s18, %s93_s18 }
   0xb   :  { %p100_p6 = por %p99_p5, %p98_p4 }
   0xd   :  { %p101_p7 = pnand %p100_p6, %p94_p3 }
   0xf   :  { %104 = shalt.err (!%p101_p7)
}
  0x10   :  { %s132_s19 = smov 128   ;;  %s133_s20 = smov 8  }
  0x11   :  { %20 = dma.hbm_to_vmem [thread:$0]  %s187_s0, 256, %s15_s10, [#allocation3], %s132_s19, %s132_s19, %s133_s20  }
  0x12   :  { %127 = dma.done.wait [#allocation3], 256  }
  0x13   :  { %128 = vsyncadd [#allocation3], 4294967040  ;;  %v26_v0 = vld [vmem:[#allocation2] sm:$0xff]  ;;  %vm31_vm0 = vcmask 261120   ;;  %v27_v1 = vld [vmem:[#allocation2 + $0x8] sm:$0xff]  ;;  %s134_s24 = smov [#allocation5]  }
  0x14   :  { %v29_v2 = vmul.f32 %v26_v0, %v26_v0  ;;  %v30_v3 = vmul.f32 %v27_v1, %v27_v1  ;;  %v74_v13 = vld [vmem:[%s188_s1] ss:$0 sm:$0xff]  ;;  %s62_s25 = sshll.u32 %s134_s24, 4  ;;  %s63_s25 = int_to_ptr.vmem [resolvable:$true] %s62_s25 }
  0x15   :  { %s105_s26 = scalar_lea.vmem %s63_s25, 256  ;;  %p110_p9 = scmp.lt.s32.totalorder %s63_s25, %s63_s25 }
  0x16   :  { %v32_v4 = vsel %vm31_vm0, %v29_v2, 0.0  ;;  %v35_v5 = vsel %vm31_vm0, %v30_v3, 0.0  ;;  %p106_p8 = scmp.ne.s32.totalorder %s63_s25, %s105_s26  ;;  %p111_p10 = scmp.lt.s32.totalorder %s105_s26, %s105_s26 }
  0x17   :  { %33 = vadd.xlane.f32.xlu0 %v32_v4 }
  0x18   :  { %p112_p11 = por %p111_p10, %p110_p9 }
  0x1a   :  { %p113_p12 = pnand %p112_p11, %p106_p8 }
  0x1b   :  { %36 = vadd.xlane.f32.xlu0 %v35_v5 }
  0xa4   :  { %v34_v6 = vpop.xlane.xlu0 %33 }
  0xa5   :  { %v39_v7 = vmul.f32 0.03125, %v34_v6 }
  0xa7   :  { %v41_v8 = vadd.f32 1e-05, %v39_v7 }
  0xa8   :  { %v37_v9 = vpop.xlane.xlu0 %36 }
  0xa9   :  { %79 = vrsqrt.f32 %v41_v8  ;;  %v40_v10 = vmul.f32 0.03125, %v37_v9 }
  0xab   :  { %v42_v11 = vadd.f32 1e-05, %v40_v10 }
  0xad   :  { %81 = vrsqrt.f32 %v42_v11 }
  0xb3   :  { %v80_v12 = vpop.eup %79 }
  0xb4   :  { %v45_v14 = vmul.f32 %v80_v12, %v26_v0 }
  0xb6   :  { %v53_v15 = vmul.f32 %v74_v13, %v45_v14 }
  0xb7   :  { %v82_v16 = vpop.eup %81 }
  0xb8   :  { %v46_v17 = vmul.f32 %v82_v16, %v27_v1  ;;  %55 = vst.msk [vmem:[#allocation5] sm:$0xff] %vm31_vm0, %v53_v15 }
  0xba   :  { %v54_v18 = vmul.f32 %v74_v13, %v46_v17 }
  0xbc   :  { %56 = vst.msk [vmem:[#allocation5 + $0x8] sm:$0xff] %vm31_vm0, %v54_v18 }
  0xbd   :  { %116 = shalt.err (!%p113_p12)
}
  0xbe   :  { %s117_s28 = scalar_lea.hbm %s189_s2, 256 }
  0xbf   :  { %p118_p13 = scmp.ne.s32.totalorder %s189_s2, %s117_s28  ;;  %p121_p0 = scmp.lt.u32.totalorder %s117_s28, %s189_s2 }
  0xc1   :  { %p123_p1 = pnand %p121_p0, %p118_p13 }
  0xc3   :  { %126 = shalt.err (!%p123_p1)
}
  0xc4   :  { %68 = dma.vmem_to_hbm [thread:$0]  %s63_s25, 256, %s189_s2, [#allocation4], %s132_s19, %s132_s19, %s133_s20  }
  0xc5   :  { %129 = dma.done.wait [#allocation4], 256  }
  0xc6   :  { %130 = vsyncadd [#allocation4], 4294967040 }
  0xc7   :  { %72 = vsyncpa [#allocation3], 1 }
  0xc8   :  { %73 = vsyncpa [#allocation4], 1 }

</bundles_post_ra>
